<compile_context>
chip_gen: v5e
topology: v5e:2x2
jax: 0.10.0
libtpu: 0.0.40
codegen_flags: <defaults>
</compile_context>

<pallas_src>
import math
import functools

import jax
import jax.numpy as jnp
import numpy as np
from jax.experimental import pallas as pl
from jax.experimental.pallas import tpu as pltpu


# ---------------------------------------------------------------------------
# Config (mirrors cfg used by the PyTorch module)
# ---------------------------------------------------------------------------
N_EMBD = 32
N_HEAD = 4
BLOCK_SIZE = 8
LORA_R = 40
LORA_ALPHA = 1.0                      # loralib default
LORA_SCALING = LORA_ALPHA / LORA_R


# ---------------------------------------------------------------------------
# Single fused kernel (one invocation, no grid):
#   qkv projection -> causal softmax attention (all batches & heads) -> out proj
# ---------------------------------------------------------------------------
def _fused_attention_kernel(x_ref, wqkv_ref, bqkv_ref, wproj_ref, bproj_ref,
                            out_ref, att_ref, *, n_batch, seq_len, n_head,
                            head_dim, scale):
    B, T, nh, hd = n_batch, seq_len, n_head, head_dim
    C = nh * hd

    x = x_ref[...]                                   # (B*T, C)
    wproj = wproj_ref[...]                           # (C, C), loaded once

    # c_attn: LoRA folded into the weight in the wrapper and pre-transposed to
    # (in, out) layout -> one MXU dot for all B*T rows + bias broadcast.
    qkv = jnp.dot(x, wqkv_ref[...],
                  preferred_element_type=jnp.float32) + bqkv_ref[...]   # (B*T, 3C)

    # Causal mask built once, shared by every (batch, head) pair.
    row = jax.lax.broadcasted_iota(jnp.int32, (T, T), 0)
    col = jax.lax.broadcasted_iota(jnp.int32, (T, T), 1)
    causal = (col <= row)[None, :, :]                # (1, T, T), broadcasts over batch

    # Output accumulator lives in vregs (16x32 f32 = 2 KiB).  c_proj is
    # accumulated per head against the matching sublane-aligned row block of
    # wproj, so the per-head y tiles are never concatenated along lanes.
    out_acc = jnp.zeros((B * T, C), jnp.float32)

    for h in range(nh):                              # compile-time unrolled
        lo = h * hd
        # (B*T, hd) -> (B, T, hd): sublane-major split, no lane movement.
        qh = qkv[:, lo:lo + hd].reshape(B, T, hd)
        kh = qkv[:, C + lo:C + lo + hd].reshape(B, T, hd)
        vh = qkv[:, 2 * C + lo:2 * C + lo + hd].reshape(B, T, hd)

        # scores[b,i,j] = q[b,i,:] . k[b,j,:]  (batched over b; k never transposed)
        s = jax.lax.dot_general(qh, kh, (((2,), (2,)), ((0,), (0,))),
                                preferred_element_type=jnp.float32) * scale
        # Large finite negative instead of -inf: identical result (exp
        # underflows to exactly 0) and NaN-safe if a row were ever fully masked.
        s = jnp.where(causal, s, -1e30)

        m = jnp.max(s, axis=-1, keepdims=True)
        p = jnp.exp(s - m)
        # exact reciprocal: approx=True (~2^-12 rel err) would endanger the
        # 1e-4 self-test tolerance; the EUP saving is negligible here.
        a = p * pl.reciprocal(jnp.sum(p, axis=-1, keepdims=True), approx=False)

        att_ref[h] = a                               # direct per-head store, no stack

        yh = jax.lax.dot_general(a, vh, (((2,), (1,)), ((0,), (0,))),
                                 preferred_element_type=jnp.float32)    # (B, T, hd)
        # c_proj accumulation against sublane-aligned 8-row block of wproj.
        out_acc = out_acc + jnp.dot(yh.reshape(B * T, hd), wproj[lo:lo + hd, :],
                                    preferred_element_type=jnp.float32)

    out_ref[...] = out_acc + bproj_ref[...]          # single (B*T, C) store


# ---------------------------------------------------------------------------
# Wrapper: fold LoRA into effective weights, launch ONE fused pallas_call
# ---------------------------------------------------------------------------
def attention_forward(x, params):
    B, T, C = x.shape
    nh = N_HEAD
    hd = C // nh
    scale = 1.0 / math.sqrt(hd)

    # Fold LoRA outside the hot kernel and pre-transpose to (in, out) layout:
    #   y = x W^T + b + s * (x A^T) B^T  ==  x (W + s * Bl A)^T + b
    # TODO(synk): cast x / folded weights to bf16 on v6e/v7x for single-pass
    # MXU dots once the test tolerance is relaxed to ~1e-3.
    w_qkv = (params["attn_w"] + LORA_SCALING * (params["attn_Bl"] @ params["attn_A"])).T
    b_qkv = params["attn_b"].reshape(1, 3 * C)
    w_proj = (params["proj_w"] + LORA_SCALING * (params["proj_Bl"] @ params["proj_A"])).T
    b_proj = params["proj_b"].reshape(1, C)

    x2d = x.reshape(B * T, C)                        # both batch rows in one invocation

    kern = functools.partial(_fused_attention_kernel, n_batch=B, seq_len=T,
                             n_head=nh, head_dim=hd, scale=scale)

    out2d, att_hb = pl.pallas_call(
        kern,
        # No grid: a single invocation, every operand is one full VMEM block
        # (total working set ~50 KiB, nothing to pipeline).
        in_specs=[pl.BlockSpec(memory_space=pltpu.MemorySpace.VMEM)] * 5,
        out_specs=(pl.BlockSpec(memory_space=pltpu.MemorySpace.VMEM),
                   pl.BlockSpec(memory_space=pltpu.MemorySpace.VMEM)),
        out_shape=(
            jax.ShapeDtypeStruct((B * T, C), jnp.float32),
            jax.ShapeDtypeStruct((nh, B, T, T), jnp.float32),
        ),
    )(x2d, w_qkv, b_qkv, w_proj, b_proj)

    # Free wrapper-side layout plumbing back to the module's output shapes.
    out = out2d.reshape(B, T, C)
    att = jnp.transpose(att_hb, (1, 0, 2, 3))        # (B, nh, T, T)
    return out, att


# ---------------------------------------------------------------------------
# Pure-JAX reference (mirrors the PyTorch module exactly, unfused LoRA)
# ---------------------------------------------------------------------------
def attention_forward_ref(x, params):
    B, T, C = x.shape
    nh, hd = N_HEAD, C // N_HEAD

    def lora_lin(z, w, b, a, bl):
        return z @ w.T + b + LORA_SCALING * ((z @ a.T) @ bl.T)

    qkv = lora_lin(x, params["attn_w"], params["attn_b"],
                   params["attn_A"], params["attn_Bl"])
    q, k, v = jnp.split(qkv, 3, axis=2)
    q = q.reshape(B, T, nh, hd).transpose(0, 2, 1, 3)
    k = k.reshape(B, T, nh, hd).transpose(0, 2, 1, 3)
    v = v.reshape(B, T, nh, hd).transpose(0, 2, 1, 3)
    s = (q @ jnp.swapaxes(k, -2, -1)) / math.sqrt(hd)
    mask = jnp.tril(jnp.ones((T, T)))[None, None]
    s = jnp.where(mask == 0, -jnp.inf, s)
    att = jax.nn.softmax(s, axis=-1)
    y = (att @ v).transpose(0, 2, 1, 3).reshape(B, T, C)
    out = lora_lin(y, params["proj_w"], params["proj_b"],
                   params["proj_A"], params["proj_Bl"])
    return out, att


# ---------------------------------------------------------------------------
# Deterministic parameter init (synthetic; matches shapes from __init__)
# ---------------------------------------------------------------------------
def init_params(key):
    ks = jax.random.split(key, 8)
    C, r = N_EMBD, LORA_R
    return {
        # c_attn: Linear(C, 3C) with LoRA rank r
        "attn_w": 0.02 * jax.random.normal(ks[0], (3 * C, C), jnp.float32),
        "attn_b": 0.02 * jax.random.normal(ks[1], (3 * C,), jnp.float32),
        "attn_A": 0.10 * jax.random.normal(ks[2], (r, C), jnp.float32),
        "attn_Bl": 0.10 * jax.random.normal(ks[3], (3 * C, r), jnp.float32),
        # c_proj: Linear(C, C) with LoRA rank r
        "proj_w": 0.02 * jax.random.normal(ks[4], (C, C), jnp.float32),
        "proj_b": 0.02 * jax.random.normal(ks[5], (C,), jnp.float32),
        "proj_A": 0.10 * jax.random.normal(ks[6], (r, C), jnp.float32),
        "proj_Bl": 0.10 * jax.random.normal(ks[7], (C, r), jnp.float32),
    }


if __name__ == "__main__":
    key = jax.random.PRNGKey(0)
    k_x, k_p = jax.random.split(key)

    B, T, C = 2, BLOCK_SIZE, N_EMBD
    x = jax.random.normal(k_x, (B, T, C), jnp.float32)
    params = init_params(k_p)

    out, att = jax.block_until_ready(attention_forward(x, params))

    out_ref, att_ref = attention_forward_ref(x, params)
    np.testing.assert_allclose(np.asarray(out), np.asarray(out_ref),
                               atol=1e-4, rtol=1e-4)
    np.testing.assert_allclose(np.asarray(att), np.asarray(att_ref),
                               atol=1e-4, rtol=1e-4)

    assert out.shape == (B, T, C) and att.shape == (B, N_HEAD, T, T)
    print("KERNEL_OK")
</pallas_src>

<mosaic_0001>
module attributes {stable_mosaic.version = 11 : i64} {
  func.func @_fused_attention_kernel(%arg0: memref<16x32xf32, #tpu.memory_space<vmem>>, %arg1: memref<32x96xf32, #tpu.memory_space<vmem>>, %arg2: memref<1x96xf32, #tpu.memory_space<vmem>>, %arg3: memref<32x32xf32, #tpu.memory_space<vmem>>, %arg4: memref<1x32xf32, #tpu.memory_space<vmem>>, %arg5: memref<16x32xf32, #tpu.memory_space<vmem>>, %arg6: memref<4x2x8x8xf32, #tpu.memory_space<vmem>>) attributes {dimension_semantics = [], scalar_prefetch = 0 : i64, scratch_operands = 0 : i64, tpu.core_type = #tpu.core_type<tc>} {
    %c0 = arith.constant 0 : index
    %c0_0 = arith.constant 0 : index
    %0 = vector.load %arg0[%c0, %c0_0] : memref<16x32xf32, #tpu.memory_space<vmem>>, vector<16x32xf32>
    %c0_1 = arith.constant 0 : index
    %c0_2 = arith.constant 0 : index
    %1 = vector.load %arg3[%c0_1, %c0_2] : memref<32x32xf32, #tpu.memory_space<vmem>>, vector<32x32xf32>
    %c0_3 = arith.constant 0 : index
    %c0_4 = arith.constant 0 : index
    %2 = vector.load %arg1[%c0_3, %c0_4] : memref<32x96xf32, #tpu.memory_space<vmem>>, vector<32x96xf32>
    %cst = arith.constant dense<0.000000e+00> : vector<16x96xf32>
    %3 = tpu.matmul %0, %2, %cst {dimension_numbers = #tpu.dot_dimension_numbers<[1], [0], [0], [1], [0, 0, 1, 1], [], []>} : vector<16x32xf32>, vector<32x96xf32>, vector<16x96xf32> -> vector<16x96xf32>
    %c0_5 = arith.constant 0 : index
    %c0_6 = arith.constant 0 : index
    %4 = vector.load %arg2[%c0_5, %c0_6] : memref<1x96xf32, #tpu.memory_space<vmem>>, vector<1x96xf32>
    %5 = vector.broadcast %4 : vector<1x96xf32> to vector<16x96xf32>
    %6 = arith.addf %3, %5 : vector<16x96xf32>
    %7 = tpu.iota {dimensions = array<i32: 0>} : vector<8x8xi32>
    %8 = tpu.iota {dimensions = array<i32: 1>} : vector<8x8xi32>
    %9 = arith.cmpi sle, %8, %7 : vector<8x8xi32>
    %10 = vector.shape_cast %9 : vector<8x8xi1> to vector<1x8x8xi1>
    %cst_7 = arith.constant 0.000000e+00 : f32
    %11 = vector.broadcast %cst_7 : f32 to vector<16x32xf32>
    %12 = vector.extract_strided_slice %6 {offsets = [0, 0], sizes = [16, 8], strides = [1, 1]} : vector<16x96xf32> to vector<16x8xf32>
    %13 = vector.shape_cast %12 : vector<16x8xf32> to vector<2x8x8xf32>
    %14 = vector.extract_strided_slice %6 {offsets = [0, 32], sizes = [16, 8], strides = [1, 1]} : vector<16x96xf32> to vector<16x8xf32>
    %15 = vector.shape_cast %14 : vector<16x8xf32> to vector<2x8x8xf32>
    %16 = vector.extract_strided_slice %6 {offsets = [0, 64], sizes = [16, 8], strides = [1, 1]} : vector<16x96xf32> to vector<16x8xf32>
    %17 = vector.shape_cast %16 : vector<16x8xf32> to vector<2x8x8xf32>
    %cst_8 = arith.constant dense<0.000000e+00> : vector<2x8x8xf32>
    %18 = tpu.matmul %13, %15, %cst_8 {dimension_numbers = #tpu.dot_dimension_numbers<[2], [2], [1], [1], [0, 0, 0, 1, 1, 1], [0], [0]>} : vector<2x8x8xf32>, vector<2x8x8xf32>, vector<2x8x8xf32> -> vector<2x8x8xf32>
    %cst_9 = arith.constant 0.353553385 : f32
    %19 = vector.broadcast %cst_9 : f32 to vector<2x8x8xf32>
    %20 = arith.mulf %18, %19 : vector<2x8x8xf32>
    %cst_10 = arith.constant -1.000000e+30 : f32
    %21 = vector.shape_cast %10 : vector<1x8x8xi1> to vector<1x8x8xi1>
    %22 = vector.broadcast %21 : vector<1x8x8xi1> to vector<2x8x8xi1>
    %23 = vector.broadcast %cst_10 : f32 to vector<2x8x8xf32>
    %24 = arith.select %22, %20, %23 : vector<2x8x8xi1>, vector<2x8x8xf32>
    %cst_11 = arith.constant dense<0xFF800000> : vector<2x8xf32>
    %25 = vector.multi_reduction <maximumf>, %24, %cst_11 [2] : vector<2x8x8xf32> to vector<2x8xf32>
    %26 = vector.shape_cast %25 : vector<2x8xf32> to vector<2x8x1xf32>
    %27 = vector.broadcast %26 : vector<2x8x1xf32> to vector<2x8x8xf32>
    %28 = arith.subf %24, %27 : vector<2x8x8xf32>
    %29 = math.exp %28 : vector<2x8x8xf32>
    %cst_12 = arith.constant dense<0.000000e+00> : vector<2x8xf32>
    %30 = vector.multi_reduction <add>, %29, %cst_12 [2] : vector<2x8x8xf32> to vector<2x8xf32>
    %31 = vector.shape_cast %30 : vector<2x8xf32> to vector<2x8x1xf32>
    %32 = tpu.reciprocal %31 : vector<2x8x1xf32> -> vector<2x8x1xf32>
    %33 = vector.broadcast %32 : vector<2x8x1xf32> to vector<2x8x8xf32>
    %34 = arith.mulf %29, %33 : vector<2x8x8xf32>
    %c0_13 = arith.constant 0 : index
    %c0_14 = arith.constant 0 : index
    %c0_15 = arith.constant 0 : index
    %c0_16 = arith.constant 0 : index
    %35 = vector.load %arg6[%c0_13, %c0_14, %c0_15, %c0_16] : memref<4x2x8x8xf32, #tpu.memory_space<vmem>>, vector<1x2x8x8xf32>
    %36 = vector.shape_cast %35 : vector<1x2x8x8xf32> to vector<2x8x8xf32>
    %37 = vector.shape_cast %34 : vector<2x8x8xf32> to vector<1x2x8x8xf32>
    tpu.vector_store %arg6[%c0_13, %c0_14, %c0_15, %c0_16], %37 {strides = array<i32>} : memref<4x2x8x8xf32, #tpu.memory_space<vmem>>, vector<1x2x8x8xf32>,
    %cst_17 = arith.constant dense<0.000000e+00> : vector<2x8x8xf32>
    %38 = tpu.matmul %34, %17, %cst_17 {dimension_numbers = #tpu.dot_dimension_numbers<[2], [1], [1], [2], [0, 0, 0, 1, 1, 2], [0], [0]>} : vector<2x8x8xf32>, vector<2x8x8xf32>, vector<2x8x8xf32> -> vector<2x8x8xf32>
    %39 = vector.shape_cast %38 : vector<2x8x8xf32> to vector<16x8xf32>
    %40 = vector.extract_strided_slice %1 {offsets = [0, 0], sizes = [8, 32], strides = [1, 1]} : vector<32x32xf32> to vector<8x32xf32>
    %cst_18 = arith.constant dense<0.000000e+00> : vector<16x32xf32>
    %41 = tpu.matmul %39, %40, %cst_18 {dimension_numbers = #tpu.dot_dimension_numbers<[1], [0], [0], [1], [0, 0, 1, 1], [], []>} : vector<16x8xf32>, vector<8x32xf32>, vector<16x32xf32> -> vector<16x32xf32>
    %42 = arith.addf %11, %41 : vector<16x32xf32>
    %43 = vector.extract_strided_slice %6 {offsets = [0, 8], sizes = [16, 8], strides = [1, 1]} : vector<16x96xf32> to vector<16x8xf32>
    %44 = vector.shape_cast %43 : vector<16x8xf32> to vector<2x8x8xf32>
    %45 = vector.extract_strided_slice %6 {offsets = [0, 40], sizes = [16, 8], strides = [1, 1]} : vector<16x96xf32> to vector<16x8xf32>
    %46 = vector.shape_cast %45 : vector<16x8xf32> to vector<2x8x8xf32>
    %47 = vector.extract_strided_slice %6 {offsets = [0, 72], sizes = [16, 8], strides = [1, 1]} : vector<16x96xf32> to vector<16x8xf32>
    %48 = vector.shape_cast %47 : vector<16x8xf32> to vector<2x8x8xf32>
    %cst_19 = arith.constant dense<0.000000e+00> : vector<2x8x8xf32>
    %49 = tpu.matmul %44, %46, %cst_19 {dimension_numbers = #tpu.dot_dimension_numbers<[2], [2], [1], [1], [0, 0, 0, 1, 1, 1], [0], [0]>} : vector<2x8x8xf32>, vector<2x8x8xf32>, vector<2x8x8xf32> -> vector<2x8x8xf32>
    %cst_20 = arith.constant 0.353553385 : f32
    %50 = vector.broadcast %cst_20 : f32 to vector<2x8x8xf32>
    %51 = arith.mulf %49, %50 : vector<2x8x8xf32>
    %cst_21 = arith.constant -1.000000e+30 : f32
    %52 = vector.shape_cast %10 : vector<1x8x8xi1> to vector<1x8x8xi1>
    %53 = vector.broadcast %52 : vector<1x8x8xi1> to vector<2x8x8xi1>
    %54 = vector.broadcast %cst_21 : f32 to vector<2x8x8xf32>
    %55 = arith.select %53, %51, %54 : vector<2x8x8xi1>, vector<2x8x8xf32>
    %cst_22 = arith.constant dense<0xFF800000> : vector<2x8xf32>
    %56 = vector.multi_reduction <maximumf>, %55, %cst_22 [2] : vector<2x8x8xf32> to vector<2x8xf32>
    %57 = vector.shape_cast %56 : vector<2x8xf32> to vector<2x8x1xf32>
    %58 = vector.broadcast %57 : vector<2x8x1xf32> to vector<2x8x8xf32>
    %59 = arith.subf %55, %58 : vector<2x8x8xf32>
    %60 = math.exp %59 : vector<2x8x8xf32>
    %cst_23 = arith.constant dense<0.000000e+00> : vector<2x8xf32>
    %61 = vector.multi_reduction <add>, %60, %cst_23 [2] : vector<2x8x8xf32> to vector<2x8xf32>
    %62 = vector.shape_cast %61 : vector<2x8xf32> to vector<2x8x1xf32>
    %63 = tpu.reciprocal %62 : vector<2x8x1xf32> -> vector<2x8x1xf32>
    %64 = vector.broadcast %63 : vector<2x8x1xf32> to vector<2x8x8xf32>
    %65 = arith.mulf %60, %64 : vector<2x8x8xf32>
    %c1 = arith.constant 1 : index
    %c0_24 = arith.constant 0 : index
    %c0_25 = arith.constant 0 : index
    %c0_26 = arith.constant 0 : index
    %66 = vector.load %arg6[%c1, %c0_24, %c0_25, %c0_26] : memref<4x2x8x8xf32, #tpu.memory_space<vmem>>, vector<1x2x8x8xf32>
    %67 = vector.shape_cast %66 : vector<1x2x8x8xf32> to vector<2x8x8xf32>
    %68 = vector.shape_cast %65 : vector<2x8x8xf32> to vector<1x2x8x8xf32>
    tpu.vector_store %arg6[%c1, %c0_24, %c0_25, %c0_26], %68 {strides = array<i32>} : memref<4x2x8x8xf32, #tpu.memory_space<vmem>>, vector<1x2x8x8xf32>,
    %cst_27 = arith.constant dense<0.000000e+00> : vector<2x8x8xf32>
    %69 = tpu.matmul %65, %48, %cst_27 {dimension_numbers = #tpu.dot_dimension_numbers<[2], [1], [1], [2], [0, 0, 0, 1, 1, 2], [0], [0]>} : vector<2x8x8xf32>, vector<2x8x8xf32>, vector<2x8x8xf32> -> vector<2x8x8xf32>
    %70 = vector.shape_cast %69 : vector<2x8x8xf32> to vector<16x8xf32>
    %71 = vector.extract_strided_slice %1 {offsets = [8, 0], sizes = [8, 32], strides = [1, 1]} : vector<32x32xf32> to vector<8x32xf32>
    %cst_28 = arith.constant dense<0.000000e+00> : vector<16x32xf32>
    %72 = tpu.matmul %70, %71, %cst_28 {dimension_numbers = #tpu.dot_dimension_numbers<[1], [0], [0], [1], [0, 0, 1, 1], [], []>} : vector<16x8xf32>, vector<8x32xf32>, vector<16x32xf32> -> vector<16x32xf32>
    %73 = arith.addf %42, %72 : vector<16x32xf32>
    %74 = vector.extract_strided_slice %6 {offsets = [0, 16], sizes = [16, 8], strides = [1, 1]} : vector<16x96xf32> to vector<16x8xf32>
    %75 = vector.shape_cast %74 : vector<16x8xf32> to vector<2x8x8xf32>
    %76 = vector.extract_strided_slice %6 {offsets = [0, 48], sizes = [16, 8], strides = [1, 1]} : vector<16x96xf32> to vector<16x8xf32>
    %77 = vector.shape_cast %76 : vector<16x8xf32> to vector<2x8x8xf32>
    %78 = vector.extract_strided_slice %6 {offsets = [0, 80], sizes = [16, 8], strides = [1, 1]} : vector<16x96xf32> to vector<16x8xf32>
    %79 = vector.shape_cast %78 : vector<16x8xf32> to vector<2x8x8xf32>
    %cst_29 = arith.constant dense<0.000000e+00> : vector<2x8x8xf32>
    %80 = tpu.matmul %75, %77, %cst_29 {dimension_numbers = #tpu.dot_dimension_numbers<[2], [2], [1], [1], [0, 0, 0, 1, 1, 1], [0], [0]>} : vector<2x8x8xf32>, vector<2x8x8xf32>, vector<2x8x8xf32> -> vector<2x8x8xf32>
    %cst_30 = arith.constant 0.353553385 : f32
    %81 = vector.broadcast %cst_30 : f32 to vector<2x8x8xf32>
    %82 = arith.mulf %80, %81 : vector<2x8x8xf32>
    %cst_31 = arith.constant -1.000000e+30 : f32
    %83 = vector.shape_cast %10 : vector<1x8x8xi1> to vector<1x8x8xi1>
    %84 = vector.broadcast %83 : vector<1x8x8xi1> to vector<2x8x8xi1>
    %85 = vector.broadcast %cst_31 : f32 to vector<2x8x8xf32>
    %86 = arith.select %84, %82, %85 : vector<2x8x8xi1>, vector<2x8x8xf32>
    %cst_32 = arith.constant dense<0xFF800000> : vector<2x8xf32>
    %87 = vector.multi_reduction <maximumf>, %86, %cst_32 [2] : vector<2x8x8xf32> to vector<2x8xf32>
    %88 = vector.shape_cast %87 : vector<2x8xf32> to vector<2x8x1xf32>
    %89 = vector.broadcast %88 : vector<2x8x1xf32> to vector<2x8x8xf32>
    %90 = arith.subf %86, %89 : vector<2x8x8xf32>
    %91 = math.exp %90 : vector<2x8x8xf32>
    %cst_33 = arith.constant dense<0.000000e+00> : vector<2x8xf32>
    %92 = vector.multi_reduction <add>, %91, %cst_33 [2] : vector<2x8x8xf32> to vector<2x8xf32>
    %93 = vector.shape_cast %92 : vector<2x8xf32> to vector<2x8x1xf32>
    %94 = tpu.reciprocal %93 : vector<2x8x1xf32> -> vector<2x8x1xf32>
    %95 = vector.broadcast %94 : vector<2x8x1xf32> to vector<2x8x8xf32>
    %96 = arith.mulf %91, %95 : vector<2x8x8xf32>
    %c2 = arith.constant 2 : index
    %c0_34 = arith.constant 0 : index
    %c0_35 = arith.constant 0 : index
    %c0_36 = arith.constant 0 : index
    %97 = vector.load %arg6[%c2, %c0_34, %c0_35, %c0_36] : memref<4x2x8x8xf32, #tpu.memory_space<vmem>>, vector<1x2x8x8xf32>
    %98 = vector.shape_cast %97 : vector<1x2x8x8xf32> to vector<2x8x8xf32>
    %99 = vector.shape_cast %96 : vector<2x8x8xf32> to vector<1x2x8x8xf32>
    tpu.vector_store %arg6[%c2, %c0_34, %c0_35, %c0_36], %99 {strides = array<i32>} : memref<4x2x8x8xf32, #tpu.memory_space<vmem>>, vector<1x2x8x8xf32>,
    %cst_37 = arith.constant dense<0.000000e+00> : vector<2x8x8xf32>
    %100 = tpu.matmul %96, %79, %cst_37 {dimension_numbers = #tpu.dot_dimension_numbers<[2], [1], [1], [2], [0, 0, 0, 1, 1, 2], [0], [0]>} : vector<2x8x8xf32>, vector<2x8x8xf32>, vector<2x8x8xf32> -> vector<2x8x8xf32>
    %101 = vector.shape_cast %100 : vector<2x8x8xf32> to vector<16x8xf32>
    %102 = vector.extract_strided_slice %1 {offsets = [16, 0], sizes = [8, 32], strides = [1, 1]} : vector<32x32xf32> to vector<8x32xf32>
    %cst_38 = arith.constant dense<0.000000e+00> : vector<16x32xf32>
    %103 = tpu.matmul %101, %102, %cst_38 {dimension_numbers = #tpu.dot_dimension_numbers<[1], [0], [0], [1], [0, 0, 1, 1], [], []>} : vector<16x8xf32>, vector<8x32xf32>, vector<16x32xf32> -> vector<16x32xf32>
    %104 = arith.addf %73, %103 : vector<16x32xf32>
    %105 = vector.extract_strided_slice %6 {offsets = [0, 24], sizes = [16, 8], strides = [1, 1]} : vector<16x96xf32> to vector<16x8xf32>
    %106 = vector.shape_cast %105 : vector<16x8xf32> to vector<2x8x8xf32>
    %107 = vector.extract_strided_slice %6 {offsets = [0, 56], sizes = [16, 8], strides = [1, 1]} : vector<16x96xf32> to vector<16x8xf32>
    %108 = vector.shape_cast %107 : vector<16x8xf32> to vector<2x8x8xf32>
    %109 = vector.extract_strided_slice %6 {offsets = [0, 88], sizes = [16, 8], strides = [1, 1]} : vector<16x96xf32> to vector<16x8xf32>
    %110 = vector.shape_cast %109 : vector<16x8xf32> to vector<2x8x8xf32>
    %cst_39 = arith.constant dense<0.000000e+00> : vector<2x8x8xf32>
    %111 = tpu.matmul %106, %108, %cst_39 {dimension_numbers = #tpu.dot_dimension_numbers<[2], [2], [1], [1], [0, 0, 0, 1, 1, 1], [0], [0]>} : vector<2x8x8xf32>, vector<2x8x8xf32>, vector<2x8x8xf32> -> vector<2x8x8xf32>
    %cst_40 = arith.constant 0.353553385 : f32
    %112 = vector.broadcast %cst_40 : f32 to vector<2x8x8xf32>
    %113 = arith.mulf %111, %112 : vector<2x8x8xf32>
    %cst_41 = arith.constant -1.000000e+30 : f32
    %114 = vector.shape_cast %10 : vector<1x8x8xi1> to vector<1x8x8xi1>
    %115 = vector.broadcast %114 : vector<1x8x8xi1> to vector<2x8x8xi1>
    %116 = vector.broadcast %cst_41 : f32 to vector<2x8x8xf32>
    %117 = arith.select %115, %113, %116 : vector<2x8x8xi1>, vector<2x8x8xf32>
    %cst_42 = arith.constant dense<0xFF800000> : vector<2x8xf32>
    %118 = vector.multi_reduction <maximumf>, %117, %cst_42 [2] : vector<2x8x8xf32> to vector<2x8xf32>
    %119 = vector.shape_cast %118 : vector<2x8xf32> to vector<2x8x1xf32>
    %120 = vector.broadcast %119 : vector<2x8x1xf32> to vector<2x8x8xf32>
    %121 = arith.subf %117, %120 : vector<2x8x8xf32>
    %122 = math.exp %121 : vector<2x8x8xf32>
    %cst_43 = arith.constant dense<0.000000e+00> : vector<2x8xf32>
    %123 = vector.multi_reduction <add>, %122, %cst_43 [2] : vector<2x8x8xf32> to vector<2x8xf32>
    %124 = vector.shape_cast %123 : vector<2x8xf32> to vector<2x8x1xf32>
    %125 = tpu.reciprocal %124 : vector<2x8x1xf32> -> vector<2x8x1xf32>
    %126 = vector.broadcast %125 : vector<2x8x1xf32> to vector<2x8x8xf32>
    %127 = arith.mulf %122, %126 : vector<2x8x8xf32>
    %c3 = arith.constant 3 : index
    %c0_44 = arith.constant 0 : index
    %c0_45 = arith.constant 0 : index
    %c0_46 = arith.constant 0 : index
    %128 = vector.load %arg6[%c3, %c0_44, %c0_45, %c0_46] : memref<4x2x8x8xf32, #tpu.memory_space<vmem>>, vector<1x2x8x8xf32>
    %129 = vector.shape_cast %128 : vector<1x2x8x8xf32> to vector<2x8x8xf32>
    %130 = vector.shape_cast %127 : vector<2x8x8xf32> to vector<1x2x8x8xf32>
    tpu.vector_store %arg6[%c3, %c0_44, %c0_45, %c0_46], %130 {strides = array<i32>} : memref<4x2x8x8xf32, #tpu.memory_space<vmem>>, vector<1x2x8x8xf32>,
    %cst_47 = arith.constant dense<0.000000e+00> : vector<2x8x8xf32>
    %131 = tpu.matmul %127, %110, %cst_47 {dimension_numbers = #tpu.dot_dimension_numbers<[2], [1], [1], [2], [0, 0, 0, 1, 1, 2], [0], [0]>} : vector<2x8x8xf32>, vector<2x8x8xf32>, vector<2x8x8xf32> -> vector<2x8x8xf32>
    %132 = vector.shape_cast %131 : vector<2x8x8xf32> to vector<16x8xf32>
    %133 = vector.extract_strided_slice %1 {offsets = [24, 0], sizes = [8, 32], strides = [1, 1]} : vector<32x32xf32> to vector<8x32xf32>
    %cst_48 = arith.constant dense<0.000000e+00> : vector<16x32xf32>
    %134 = tpu.matmul %132, %133, %cst_48 {dimension_numbers = #tpu.dot_dimension_numbers<[1], [0], [0], [1], [0, 0, 1, 1], [], []>} : vector<16x8xf32>, vector<8x32xf32>, vector<16x32xf32> -> vector<16x32xf32>
    %135 = arith.addf %104, %134 : vector<16x32xf32>
    %c0_49 = arith.constant 0 : index
    %c0_50 = arith.constant 0 : index
    %136 = vector.load %arg4[%c0_49, %c0_50] : memref<1x32xf32, #tpu.memory_space<vmem>>, vector<1x32xf32>
    %137 = vector.broadcast %136 : vector<1x32xf32> to vector<16x32xf32>
    %138 = arith.addf %135, %137 : vector<16x32xf32>
    %c0_51 = arith.constant 0 : index
    %c0_52 = arith.constant 0 : index
    %139 = vector.load %arg5[%c0_51, %c0_52] : memref<16x32xf32, #tpu.memory_space<vmem>>, vector<16x32xf32>
    tpu.vector_store %arg5[%c0_51, %c0_52], %138 {strides = array<i32>} : memref<16x32xf32, #tpu.memory_space<vmem>>, vector<16x32xf32>,
    return
  }
}

</mosaic_0001>

<bundles_post_ra>
// kernel: tpu_custom_call.1
= control target key start
LH: loop header
LB: loop body
LE: loop exit
PB: predicated region body
PF: predicated region fallthrough
CT: control target
= control target key end

     0   :  { %12 = vsyncpa [#allocation3], 0  ;;  %s1375_s0 = inlined_call_operand.hbm [shape: f32[16,32], index: 0, kind: input, shape index: {}]   ;;  %s1376_s1 = inlined_call_operand.hbm [shape: f32[32,96], index: 1, kind: input, shape index: {}]   ;;  %s1377_s2 = inlined_call_operand.vmem [shape: f32[1,96], index: 2, kind: input, shape index: {}]   ;;  %s1378_s3 = inlined_call_operand.hbm [shape: f32[32,32], index: 3, kind: input, shape index: {}]   ;;  %s1379_s4 = inlined_call_operand.vmem [shape: f32[1,32], index: 4, kind: input, shape index: {}]   ;;  %s1380_s5 = inlined_call_operand.hbm [shape: f32[16,32], index: 5, kind: output, shape index: {0}]   ;;  %s1381_s6 = inlined_call_operand.hbm [shape: f32[4,2,8,8], index: 6, kind: output, shape index: {1}]  }
   0x1   :  { %13 = vsyncpa [#allocation6], 0 }
   0x2   :  { %14 = vsyncpa [#allocation4], 0 }
   0x3   :  { %15 = vsyncpa [#allocation10], 0  ;;  %s33_s23 = sshll.u32 %s1376_s1, 4  ;;  %s1152_s24 = smov [#allocation5]   ;;  %s34_s23 = int_to_ptr.hbm [resolvable:$true] %s33_s23 }
   0x4   :  { %s35_s25 = sshll.u32 %s1152_s24, 4  ;;  %s20_s28 = sshll.u32 %s1375_s0, 4  ;;  %s36_s25 = int_to_ptr.vmem [resolvable:$true] %s35_s25  ;;  %s21_s28 = int_to_ptr.hbm [resolvable:$true] %s20_s28 }
   0x5   :  { %s1153_s29 = smov 128   ;;  %s1154_s30 = smov 8  }
   0x6   :  { %41 = dma.hbm_to_vmem [thread:$0]  %s34_s23, 512, %s36_s25, [#allocation6], %s1153_s29, %s1153_s29, %s1154_s30  }
   0x7   :  { %s1155_s7 = smov [#allocation2]   ;;  %s48_s1 = sshll.u32 %s1378_s3, 4  ;;  %s49_s1 = int_to_ptr.hbm [resolvable:$true] %s48_s1 }
   0x8   :  { %s22_s8 = sshll.u32 %s1155_s7, 4  ;;  %s1156_s0 = smov [#allocation7]   ;;  %s23_s8 = int_to_ptr.vmem [resolvable:$true] %s22_s8 }
   0x9   :  { %28 = dma.hbm_to_vmem [thread:$0]  %s21_s28, 256, %s23_s8, [#allocation3], %s1153_s29, %s1153_s29, %s1154_s30  }
   0xa   :  { %s50_s11 = sshll.u32 %s1156_s0, 4  ;;  %s51_s11 = int_to_ptr.vmem [resolvable:$true] %s50_s11 }
   0xb   :  { %56 = dma.hbm_to_vmem [thread:$0]  %s49_s1, 512, %s51_s11, [#allocation6], %s1153_s29, %s1153_s29, %s1154_s30  }
   0xc   :  { %1144 = dma.done.wait [#allocation3], 256  }
   0xd   :  { %1145 = vsyncadd [#allocation3], 4294967040 }
   0xe   :  { %1146 = dma.done.wait [#allocation6], 1024  }
   0xf   :  { %1147 = vsyncadd [#allocation6], 4294966272  ;;  %v80_v0 = vld [vmem:[#allocation5 + $0x18] sm:$0xff]  ;;  %v79_v1 = vld [vmem:[#allocation5 + $0x10] sm:$0xff]  ;;  %vm85_vm0 = vcmask 261120   ;;  %s1157_s13 = smov 64   ;;  %v115_v12 = vlaneseq }
  0x10   :  { %104 = vmatpush.msra.mxu0 %v80_v0  ;;  %v78_v2 = vld [vmem:[#allocation5 + $0x8] sm:$0xff]  ;;  %v77_v3 = vld [vmem:[#allocation5] sm:$0xff]  ;;  %v71_v4 = vld [vmem:[#allocation2] sm:$0xff]  ;;  %s1158_s14 = smov 96   ;;  %s1159_s15 = smov 88   ;;  %vm123_vm1 = vcmask 64512  }
  0x11   :  { %v990_v5 = vld [vmem:[%s1377_s2] ss:$0 sm:$0xff]  ;;  %s1160_s16 = smov 120   ;;  %v72_v11 = vld [vmem:[#allocation2 + $0x8] sm:$0xff]  ;;  %v116_v13 = vshrl.u32 %v115_v12, 7  ;;  %v118_v14 = vand.u32 127, %v115_v12 }
  0x12   :  { %105 = vmatpush.msra.mxu0 %v79_v1  ;;  %v73_v41 = vld [vmem:[#allocation7] sm:$0xff]  ;;  %s1161_s2 = smov 80   ;;  %s1162_s17 = smov 56  }
  0x13   :  { %vm1242_vm2 = vcmp.le.s32.totalorder %v118_v14, %v116_v13  ;;  %s1163_s18 = smov 112   ;;  %s1164_s19 = smov 72  }
  0x14   :  { %106 = vmatpush.msra.mxu0 %v78_v2  ;;  %s1165_s20 = smov 104   ;;  %s1166_s21 = smov 48  }
  0x15   :  { %s1167_s22 = smov 40   ;;  %s1168_s23 = smov [#allocation9]  }
  0x16   :  { %107 = vmatpush.msra.mxu0 %v77_v3  ;;  %s917_s24 = sshll.u32 %s1168_s23, 4  ;;  %s919_s27 = sshll.u32 %s1381_s6, 4  ;;  %s918_s24 = int_to_ptr.vmem [resolvable:$true] %s917_s24  ;;  %s920_s27 = int_to_ptr.hbm [resolvable:$true] %s919_s27 }
  0x17   :  { %938 = vmatmul.msk.f32.vlgmr.msra.gmra.mxu0 %vm85_vm0, %v71_v4  ;;  %s1169_s6 = smov [#allocation8]   ;;  %s906_s1 = sshll.u32 %s1380_s5, 4  ;;  %s907_s1 = int_to_ptr.hbm [resolvable:$true] %s906_s1 }
  0x18   :  { %496 = vmatpush.msrb.mxu0 %v73_v41  ;;  %s904_s8 = sshll.u32 %s1169_s6, 4  ;;  %s905_s8 = int_to_ptr.vmem [resolvable:$true] %s904_s8 }
  0x1f   :  { %939 = vmatmul.msk.f32.gmra.mxu0 %vm85_vm0, %v72_v11 }
  0x94   :  { %v109_v6 = vpop.f32.mrf.mxu0 }
  0x95   :  { %v1227_v7 = vadd.f32 %v990_v5, %v109_v6 }
  0x97   :  { %231 = vrot.lane.b32.xlu2 %v1227_v7, %s1157_s13  ;;  %121 = vrot.lane.b32.xlu0 %v1227_v7, %s1158_s14 }
  0x9c   :  { %v112_v25 = vpop.f32.mrf.mxu0 }
  0x9d   :  { %v1250_v26 = vadd.f32 %v990_v5, %v112_v25 }
  0x9f   :  { %285 = vrot.lane.b32.xlu2 %v1227_v7, %s1159_s15 }
  0xa7   :  { %283 = vrot.lane.b32.xlu2 %v1227_v7, %s1160_s16 }
  0xf1   :  { %v232_v8 = vpop.permute.xlu2 %231 }
  0xf9   :  { %v286_v10 = vpop.permute.xlu2 %285 }
 0x101   :  { %v284_v40 = vpop.permute.xlu2 %283 }
 0x109   :  { %v122_v9 = vpop.permute.xlu0 %121 }
 0x10a   :  { %940 = vmatpush.xpose.msk.msra.mxu1 %vm123_vm1, %v122_v9 }
 0x10d   :  { %941 = vmatmul.msk.f32.vlgmr.msra.gmra.mxu1 %vm123_vm1, %v1227_v7 }
 0x10e   :  { %252 = vmatpush.msrb.mxu1 %v232_v8 }
 0x110   :  { %946 = vmatpush.xpose.msk.msra.mxu1 %vm123_vm1, %v286_v10 }
 0x18a   :  { %v145_v15 = vpop.f32.mrf.mxu1 }
 0x18b   :  { %v175_v17 = vmul.f32 0.35355338, %v145_v15 }
 0x18d   :  { %v179_v18 = vsel %vm1242_vm2, %v175_v17, -1e+30 }
 0x18e   :  { %v181_v19 = vsel %vm123_vm1, %v179_v18, -inf }
 0x18f   :  { %182 = vmax.xlane.f32.xlu0 %v181_v19 }
 0x202   :  { %v183_v20 = vpop.xlane.xlu0 %182 }
 0x203   :  { %v187_v21 = vsub.f32 %v179_v18, %v183_v20 }
 0x205   :  { %v189_v22 = vmul.f32 1.442695, %v187_v21 }
 0x207   :  { %992 = vpow2.f32 %v189_v22 }
 0x20d   :  { %v993_v23 = vpop.eup %992 }
 0x20e   :  { %v193_v24 = vsel %vm123_vm1, %v993_v23, 0.0 }
 0x20f   :  { %194 = vadd.xlane.f32.xlu1 %v193_v24 }
 0x228   :  { %149 = vrot.lane.b32.xlu1 %v1250_v26, %s1158_s14 }
 0x282   :  { %v195_v27 = vpop.xlane.xlu1 %194 }
 0x283   :  { %994 = vrcp.f32 %v195_v27  ;;  %v210_v31 = vand.u32 2147483648, %v195_v27  ;;  %v208_v33 = vand.u32 2147483647, %v195_v27  ;;  %vm204_vm4 = vweird.f32 %v195_v27 }
 0x285   :  { %v211_v35 = vor.u32 1.1754944e-38, %v210_v31  ;;  %vm209_vm6 = vcmp.eq.f32.partialorder %v208_v33, 8.507059e+37 }
 0x289   :  { %v995_v28 = vpop.eup %994 }
 0x28a   :  { %v200_v29 = vmul.f32 %v995_v28, %v195_v27  ;;  %vm205_vm3 = vweird.f32 %v995_v28 }
 0x28b   :  { %vm206_vm5 = vmor %vm204_vm4, %vm205_vm3 }
 0x28c   :  { %v201_v30 = vsub.f32 1.0, %v200_v29 }
 0x28e   :  { %v202_v32 = vmul.f32 %v995_v28, %v201_v30 }
 0x290   :  { %v203_v34 = vadd.f32 %v995_v28, %v202_v32 }
 0x292   :  { %v207_v36 = vsel %vm206_vm5, %v995_v28, %v203_v34 }
 0x293   :  { %v212_v37 = vsel %vm209_vm6, %v211_v35, %v207_v36  ;;  %v74_v35 = vld [vmem:[#allocation7 + $0x8] sm:$0xff] }
 0x294   :  { %v227_v38 = vmul.f32 %v993_v23, %v212_v37 }
 0x296   :  { %229 = vst.msk [vmem:[#allocation9] sm:$0xff] %vm123_vm1, %v227_v38  ;;  %944 = vmatmul.msk.f32.vlgmr.msrb.gmra.mxu1 %vm123_vm1, %v227_v38 }
 0x29a   :  { %v150_v39 = vpop.permute.xlu1 %149 }
 0x29b   :  { %942 = vmatpush.xpose.msk.msra.mxu2 %vm123_vm1, %v150_v39 }
 0x29e   :  { %943 = vmatmul.msk.f32.vlgmr.msra.gmra.mxu2 %vm123_vm1, %v1250_v26  ;;  %947 = vmatmul.msk.f32.vlgmr.msra.gmra.mxu1 %vm123_vm1, %v284_v40 }
 0x313   :  { %v254_v42 = vpop.f32.mrf.mxu1 }
 0x314   :  { %954 = vmatmul.msk.f32.vlgmr.msrb.gmra.mxu0 %vm123_vm1, %v254_v42 }
 0x31b   :  { %v308_v43 = vpop.f32.mrf.mxu1 }
 0x31c   :  { %v339_v44 = vmul.f32 0.35355338, %v308_v43 }
 0x31e   :  { %v341_v45 = vsel %vm1242_vm2, %v339_v44, -1e+30 }
 0x31f   :  { %v343_v46 = vsel %vm123_vm1, %v341_v45, -inf }
 0x320   :  { %344 = vmax.xlane.f32.xlu1 %v343_v46 }
 0x321   :  { %v172_v47 = vpop.f32.mrf.mxu2 }
 0x322   :  { %v176_v48 = vmul.f32 0.35355338, %v172_v47 }
 0x324   :  { %v180_v49 = vsel %vm1242_vm2, %v176_v48, -1e+30 }
 0x325   :  { %v184_v50 = vsel %vm123_vm1, %v180_v49, -inf }
 0x326   :  { %185 = vmax.xlane.f32.xlu2 %v184_v50 }
 0x339   :  { %311 = vrot.lane.b32.xlu1 %v1250_v26, %s1160_s16 }
 0x33e   :  { %257 = vrot.lane.b32.xlu2 %v1250_v26, %s1157_s13 }
 0x346   :  { %506 = vrot.lane.b32.xlu2 %v1227_v7, %s1161_s2 }
 0x393   :  { %v345_v57 = vpop.xlane.xlu1 %344 }
 0x394   :  { %v349_v58 = vsub.f32 %v341_v45, %v345_v57 }
 0x396   :  { %v351_v59 = vmul.f32 1.442695, %v349_v58 }
 0x399   :  { %v186_v51 = vpop.xlane.xlu2 %185 }
 0x39a   :  { %v188_v52 = vsub.f32 %v180_v49, %v186_v51 }
 0x39c   :  { %v191_v53 = vmul.f32 1.442695, %v188_v52 }
 0x39e   :  { %996 = vpow2.f32 %v191_v53 }
 0x39f   :  { %998 = vpow2.f32 %v351_v59 }
 0x3a1   :  { %v258_v54 = vpop.permute.xlu2 %257 }
 0x3a2   :  { %278 = vmatpush.msra.mxu3 %v258_v54 }
 0x3a4   :  { %v997_v55 = vpop.eup %996 }
 0x3a5   :  { %v196_v56 = vsel %vm123_vm1, %v997_v55, 0.0  ;;  %v999_v60 = vpop.eup %998 }
 0x3a6   :  { %197 = vadd.xlane.f32.xlu0 %v196_v56  ;;  %v355_v61 = vsel %vm123_vm1, %v999_v60, 0.0 }
 0x3a9   :  { %v507_v14 = vpop.permute.xlu2 %506 }
 0x3ab   :  { %v312_v12 = vpop.permute.xlu1 %311 }
 0x3ba   :  { %313 = vrot.lane.b32.xlu0 %v1250_v26, %s1159_s15 }
 0x3c2   :  { %394 = vrot.lane.b32.xlu0 %v1227_v7, %s1162_s17 }
 0x3ec   :  { %356 = vadd.xlane.f32.xlu0 %v355_v61 }
 0x400   :  { %504 = vrot.lane.b32.xlu0 %v1227_v7, %s1163_s18 }
 0x419   :  { %v198_v62 = vpop.xlane.xlu0 %197 }
 0x41a   :  { %1000 = vrcp.f32 %v198_v62  ;;  %v224_v2 = vand.u32 2147483648, %v198_v62  ;;  %v222_v4 = vand.u32 2147483647, %v198_v62  ;;  %vm218_vm8 = vweird.f32 %v198_v62 }
 0x41c   :  { %v225_v6 = vor.u32 1.1754944e-38, %v224_v2  ;;  %vm223_vm10 = vcmp.eq.f32.partialorder %v222_v4, 8.507059e+37 }
 0x420   :  { %v1001_v63 = vpop.eup %1000 }
 0x421   :  { %v214_v0 = vmul.f32 %v1001_v63, %v198_v62  ;;  %vm219_vm7 = vweird.f32 %v1001_v63 }
 0x422   :  { %vm220_vm9 = vmor %vm218_vm8, %vm219_vm7 }
 0x423   :  { %v215_v1 = vsub.f32 1.0, %v214_v0 }
 0x425   :  { %v216_v3 = vmul.f32 %v1001_v63, %v215_v1 }
 0x427   :  { %v217_v5 = vadd.f32 %v1001_v63, %v216_v3 }
 0x429   :  { %v221_v8 = vsel %vm220_vm9, %v1001_v63, %v217_v5 }
 0x42a   :  { %v226_v9 = vsel %vm223_vm10, %v225_v6, %v221_v8 }
 0x42b   :  { %v228_v10 = vmul.f32 %v997_v55, %v226_v9 }
 0x42c   :  { %v314_v11 = vpop.permute.xlu0 %313 }
 0x42d   :  { %230 = vst.msk [vmem:[#allocation9 + $0x8] sm:$0xff] %vm123_vm1, %v228_v10  ;;  %945 = vmatmul.msk.f32.vlgmr.msra.gmra.mxu3 %vm123_vm1, %v228_v10  ;;  %948 = vmatpush.xpose.msk.msrb.mxu2 %vm123_vm1, %v314_v11 }
 0x430   :  { %949 = vmatmul.msk.f32.vlgmr.msrb.gmra.mxu2 %vm123_vm1, %v312_v12 }
 0x431   :  { %467 = vmatpush.msra.mxu2 %v74_v35 }
 0x434   :  { %v395_v13 = vpop.permute.xlu0 %394 }
 0x435   :  { %415 = vmatpush.msrb.mxu3 %v395_v13 }
 0x437   :  { %956 = vmatpush.xpose.msk.msra.mxu3 %vm123_vm1, %v507_v14 }
 0x45f   :  { %v357_v15 = vpop.xlane.xlu0 %356 }
 0x460   :  { %1002 = vrcp.f32 %v357_v15  ;;  %v372_v20 = vand.u32 2147483648, %v357_v15  ;;  %v370_v22 = vand.u32 2147483647, %v357_v15  ;;  %vm366_vm12 = vweird.f32 %v357_v15 }
 0x462   :  { %v373_v24 = vor.u32 1.1754944e-38, %v372_v20  ;;  %vm371_vm14 = vcmp.eq.f32.partialorder %v370_v22, 8.507059e+37 }
 0x466   :  { %v1003_v17 = vpop.eup %1002 }
 0x467   :  { %v362_v18 = vmul.f32 %v1003_v17, %v357_v15  ;;  %vm367_vm11 = vweird.f32 %v1003_v17 }
 0x468   :  { %vm368_vm13 = vmor %vm366_vm12, %vm367_vm11 }
 0x469   :  { %v363_v19 = vsub.f32 1.0, %v362_v18 }
 0x46b   :  { %v364_v21 = vmul.f32 %v1003_v17, %v363_v19 }
 0x46d   :  { %v365_v23 = vadd.f32 %v1003_v17, %v364_v21  ;;  %v1321_v21 = vpop.f32.mrf.mxu0 }
 0x46f   :  { %v369_v25 = vsel %vm368_vm13, %v1003_v17, %v365_v23 }
 0x470   :  { %v374_v27 = vsel %vm371_vm14, %v373_v24, %v369_v25 }
 0x471   :  { %v389_v28 = vmul.f32 %v999_v60, %v374_v27 }
 0x472   :  { %v505_v29 = vpop.permute.xlu0 %504 }
 0x473   :  { %392 = vst.msk [vmem:[#allocation9 + $0x10] sm:$0xff] %vm123_vm1, %v389_v28  ;;  %950 = vmatmul.msk.f32.vlgmr.msrb.gmra.mxu3 %vm123_vm1, %v389_v28 }
 0x47b   :  { %957 = vmatmul.msk.f32.vlgmr.msra.gmra.mxu3 %vm123_vm1, %v505_v29 }
 0x4b0   :  { %v280_v30 = vpop.f32.mrf.mxu3 }
 0x4b1   :  { %955 = vmatmul.msk.f32.gmra.mxu0 %vm123_vm1, %v280_v30 }
 0x4b3   :  { %v336_v31 = vpop.f32.mrf.mxu2 }
 0x4b4   :  { %v340_v32 = vmul.f32 0.35355338, %v336_v31 }
 0x4b6   :  { %v342_v33 = vsel %vm1242_vm2, %v340_v32, -1e+30 }
 0x4b7   :  { %v346_v34 = vsel %vm123_vm1, %v342_v33, -inf }
 0x4b8   :  { %347 = vmax.xlane.f32.xlu2 %v346_v34 }
 0x4d0   :  { %532 = vrot.lane.b32.xlu2 %v1250_v26, %s1163_s18 }
 0x4f6   :  { %v417_v36 = vpop.f32.mrf.mxu3 }
 0x4f7   :  { %952 = vmatmul.msk.f32.vlgmr.msra.gmra.mxu2 %vm123_vm1, %v417_v36 }
 0x4fe   :  { %v529_v37 = vpop.f32.mrf.mxu3 }
 0x4ff   :  { %v560_v38 = vmul.f32 0.35355338, %v529_v37 }
 0x501   :  { %v562_v39 = vsel %vm1242_vm2, %v560_v38, -1e+30 }
 0x502   :  { %v564_v40 = vsel %vm123_vm1, %v562_v39, -inf }
 0x503   :  { %565 = vmax.xlane.f32.xlu1 %v564_v40 }
 0x51c   :  { %420 = vrot.lane.b32.xlu1 %v1250_v26, %s1162_s17 }
 0x524   :  { %700 = vrot.lane.b32.xlu1 %v1227_v7, %s1164_s19 }
 0x52b   :  { %v348_v41 = vpop.xlane.xlu2 %347 }
 0x52c   :  { %v350_v42 = vsub.f32 %v342_v33, %v348_v41  ;;  %726 = vrot.lane.b32.xlu1 %v1250_v26, %s1165_s20  ;;  %v75_v33 = vld [vmem:[#allocation7 + $0x10] sm:$0xff] }
 0x52d   :  { %688 = vmatpush.msrb.mxu2 %v75_v33 }
 0x52e   :  { %v353_v43 = vmul.f32 1.442695, %v350_v42  ;;  %v1324_v23 = vpop.f32.mrf.mxu0 }
 0x530   :  { %1004 = vpow2.f32 %v353_v43 }
 0x533   :  { %v533_v2 = vpop.permute.xlu2 %532 }
 0x536   :  { %v1005_v44 = vpop.eup %1004 }
 0x537   :  { %v358_v45 = vsel %vm123_vm1, %v1005_v44, 0.0 }
 0x538   :  { %359 = vadd.xlane.f32.xlu0 %v358_v45 }
 0x54c   :  { %534 = vrot.lane.b32.xlu0 %v1250_v26, %s1161_s2 }
 0x554   :  { %615 = vrot.lane.b32.xlu0 %v1227_v7, %s1166_s21 }
 0x55c   :  { %698 = vrot.lane.b32.xlu0 %v1227_v7, %s1165_s20 }
 0x576   :  { %v566_v46 = vpop.xlane.xlu1 %565 }
 0x577   :  { %v570_v47 = vsub.f32 %v562_v39, %v566_v46 }
 0x579   :  { %v572_v48 = vmul.f32 1.442695, %v570_v47 }
 0x57b   :  { %1006 = vpow2.f32 %v572_v48 }
 0x581   :  { %v1007_v49 = vpop.eup %1006 }
 0x582   :  { %v576_v50 = vsel %vm123_vm1, %v1007_v49, 0.0 }
 0x583   :  { %577 = vadd.xlane.f32.xlu2 %v576_v50 }
 0x58e   :  { %v421_v51 = vpop.permute.xlu1 %420 }
 0x58f   :  { %441 = vmatpush.msrb.mxu1 %v421_v51 }
 0x596   :  { %v701_v52 = vpop.permute.xlu1 %700 }
 0x597   :  { %964 = vmatpush.xpose.msk.msra.mxu0 %vm123_vm1, %v701_v52 }
 0x59b   :  { %728 = vrot.lane.b32.xlu2 %v1250_v26, %s1164_s19 }
 0x59e   :  { %v727_v20 = vpop.permute.xlu1 %726 }
 0x5ab   :  { %v360_v53 = vpop.xlane.xlu0 %359 }
 0x5ac   :  { %1008 = vrcp.f32 %v360_v53  ;;  %v386_v57 = vand.u32 2147483648, %v360_v53  ;;  %v384_v59 = vand.u32 2147483647, %v360_v53  ;;  %vm380_vm3 = vweird.f32 %v360_v53 }
 0x5ae   :  { %v387_v61 = vor.u32 1.1754944e-38, %v386_v57  ;;  %vm385_vm5 = vcmp.eq.f32.partialorder %v384_v59, 8.507059e+37 }
 0x5b2   :  { %v1009_v54 = vpop.eup %1008 }
 0x5b3   :  { %v376_v55 = vmul.f32 %v1009_v54, %v360_v53  ;;  %vm381_vm15 = vweird.f32 %v1009_v54 }
 0x5b4   :  { %vm382_vm4 = vmor %vm380_vm3, %vm381_vm15 }
 0x5b5   :  { %v377_v56 = vsub.f32 1.0, %v376_v55 }
 0x5b7   :  { %v378_v58 = vmul.f32 %v1009_v54, %v377_v56 }
 0x5b9   :  { %v379_v60 = vadd.f32 %v1009_v54, %v378_v58 }
 0x5bb   :  { %v383_v62 = vsel %vm382_vm4, %v1009_v54, %v379_v60 }
 0x5bc   :  { %v388_v63 = vsel %vm385_vm5, %v387_v61, %v383_v62 }
 0x5bd   :  { %v390_v0 = vmul.f32 %v1005_v44, %v388_v63 }
 0x5be   :  { %v535_v1 = vpop.permute.xlu0 %534 }
 0x5bf   :  { %393 = vst.msk [vmem:[#allocation9 + $0x18] sm:$0xff] %vm123_vm1, %v390_v0  ;;  %951 = vmatmul.msk.f32.vlgmr.msrb.gmra.mxu1 %vm123_vm1, %v390_v0 }
 0x5c0   :  { %958 = vmatpush.xpose.msk.msra.mxu1 %vm123_vm1, %v535_v1 }
 0x5c6   :  { %v616_v3 = vpop.permute.xlu0 %615 }
 0x5c7   :  { %959 = vmatmul.msk.f32.vlgmr.msra.gmra.mxu1 %vm123_vm1, %v533_v2  ;;  %636 = vmatpush.msrb.mxu3 %v616_v3 }
 0x5ce   :  { %v699_v4 = vpop.permute.xlu0 %698 }
 0x5cf   :  { %965 = vmatmul.msk.f32.vlgmr.msra.gmra.mxu0 %vm123_vm1, %v699_v4 }
 0x5f6   :  { %v578_v5 = vpop.xlane.xlu2 %577 }
 0x5f7   :  { %1010 = vrcp.f32 %v578_v5  ;;  %v593_v11 = vand.u32 2147483648, %v578_v5  ;;  %v591_v13 = vand.u32 2147483647, %v578_v5  ;;  %vm587_vm7 = vweird.f32 %v578_v5 }
 0x5f9   :  { %v594_v15 = vor.u32 1.1754944e-38, %v593_v11  ;;  %vm592_vm9 = vcmp.eq.f32.partialorder %v591_v13, 8.507059e+37 }
 0x5fd   :  { %v1011_v6 = vpop.eup %1010 }
 0x5fe   :  { %v583_v8 = vmul.f32 %v1011_v6, %v578_v5  ;;  %v729_v9 = vpop.permute.xlu2 %728  ;;  %vm588_vm6 = vweird.f32 %v1011_v6 }
 0x5ff   :  { %966 = vmatpush.xpose.msk.msra.mxu3 %vm123_vm1, %v729_v9  ;;  %vm589_vm8 = vmor %vm587_vm7, %vm588_vm6 }
 0x600   :  { %v584_v10 = vsub.f32 1.0, %v583_v8 }
 0x602   :  { %v585_v12 = vmul.f32 %v1011_v6, %v584_v10 }
 0x604   :  { %v586_v14 = vadd.f32 %v1011_v6, %v585_v12 }
 0x606   :  { %v590_v17 = vsel %vm589_vm8, %v1011_v6, %v586_v14 }
 0x607   :  { %v595_v18 = vsel %vm592_vm9, %v594_v15, %v590_v17 }
 0x608   :  { %v610_v19 = vmul.f32 %v1007_v49, %v595_v18 }
 0x60a   :  { %613 = vst.msk [vmem:[#allocation9 + $0x20] sm:$0xff] %vm123_vm1, %v610_v19  ;;  %960 = vmatmul.msk.f32.vlgmr.msrb.gmra.mxu3 %vm123_vm1, %v610_v19 }
 0x612   :  { %967 = vmatmul.msk.f32.vlgmr.msra.gmra.mxu3 %vm123_vm1, %v727_v20 }
 0x63c   :  { %v443_v22 = vpop.f32.mrf.mxu1 }
 0x63d   :  { %953 = vmatmul.msk.f32.gmra.mxu2 %vm123_vm1, %v443_v22 }
 0x644   :  { %v557_v24 = vpop.f32.mrf.mxu1 }
 0x645   :  { %v561_v25 = vmul.f32 0.35355338, %v557_v24 }
 0x647   :  { %v563_v27 = vsel %vm1242_vm2, %v561_v25, -1e+30 }
 0x648   :  { %v567_v28 = vsel %vm123_vm1, %v563_v27, -inf }
 0x649   :  { %568 = vmax.xlane.f32.xlu2 %v567_v28 }
 0x64c   :  { %v723_v29 = vpop.f32.mrf.mxu0 }
 0x64d   :  { %v754_v30 = vmul.f32 0.35355338, %v723_v29 }
 0x64f   :  { %v756_v31 = vsel %vm1242_vm2, %v754_v30, -1e+30 }
 0x650   :  { %v758_v32 = vsel %vm123_vm1, %v756_v31, -inf }
 0x651   :  { %759 = vmax.xlane.f32.xlu0 %v758_v32 }
 0x68d   :  { %v638_v34 = vpop.f32.mrf.mxu3 }
 0x68e   :  { %962 = vmatmul.msk.f32.vlgmr.msrb.gmra.mxu2 %vm123_vm1, %v638_v34 }
 0x695   :  { %v751_v35 = vpop.f32.mrf.mxu3 }
 0x696   :  { %v755_v36 = vmul.f32 0.35355338, %v751_v35  ;;  %v469_v35 = vpop.f32.mrf.mxu2 }
 0x698   :  { %v757_v37 = vsel %vm1242_vm2, %v755_v36, -1e+30 }
 0x699   :  { %v761_v38 = vsel %vm123_vm1, %v757_v37, -inf }
 0x69a   :  { %762 = vmax.xlane.f32.xlu1 %v761_v38  ;;  %v499_v38 = vadd.f32 %v1321_v21, %v469_v35 }
 0x6bc   :  { %v569_v39 = vpop.xlane.xlu2 %568 }
 0x6bd   :  { %v571_v40 = vsub.f32 %v563_v27, %v569_v39 }
 0x6bf   :  { %v574_v41 = vmul.f32 1.442695, %v571_v40  ;;  %v991_v40 = vld [vmem:[%s1379_s4] ss:$0 sm:$0xff] }
 0x6c0   :  { %v472_v36 = vpop.f32.mrf.mxu2 }
 0x6c1   :  { %1012 = vpow2.f32 %v574_v41 }
 0x6c4   :  { %v760_v42 = vpop.xlane.xlu0 %759 }
 0x6c5   :  { %v764_v43 = vsub.f32 %v756_v31, %v760_v42  ;;  %v76_v31 = vld [vmem:[#allocation7 + $0x18] sm:$0xff] }
 0x6c6   :  { %882 = vmatpush.msrb.mxu3 %v76_v31 }
 0x6c7   :  { %v1013_v44 = vpop.eup %1012  ;;  %v766_v45 = vmul.f32 1.442695, %v764_v43 }
 0x6c8   :  { %v579_v46 = vsel %vm123_vm1, %v1013_v44, 0.0 }
 0x6c9   :  { %1014 = vpow2.f32 %v766_v45  ;;  %580 = vadd.xlane.f32.xlu2 %v579_v46  ;;  %v502_v45 = vadd.f32 %v1324_v23, %v472_v36 }
 0x6cf   :  { %v1015_v47 = vpop.eup %1014 }
 0x6d0   :  { %v770_v48 = vsel %vm123_vm1, %v1015_v47, 0.0 }
 0x6d1   :  { %771 = vadd.xlane.f32.xlu0 %v770_v48 }
 0x6e1   :  { %641 = vrot.lane.b32.xlu2 %v1250_v26, %s1166_s21 }
 0x6e5   :  { %809 = vrot.lane.b32.xlu0 %v1227_v7, %s1167_s22 }
 0x70d   :  { %v763_v16 = vpop.xlane.xlu1 %762 }
 0x70e   :  { %v765_v49 = vsub.f32 %v757_v37, %v763_v16 }
 0x710   :  { %v768_v50 = vmul.f32 1.442695, %v765_v49 }
 0x711   :  { %v690_v37 = vpop.f32.mrf.mxu2 }
 0x712   :  { %1016 = vpow2.f32 %v768_v50  ;;  %v696_v39 = vadd.f32 %v690_v37, %v499_v38 }
 0x718   :  { %v1341_v51 = vpop.eup %1016 }
 0x719   :  { %v773_v52 = vsel %vm123_vm1, %v1341_v51, 0.0 }
 0x71a   :  { %774 = vadd.xlane.f32.xlu1 %v773_v52 }
 0x733   :  { %835 = vrot.lane.b32.xlu1 %v1250_v26, %s1167_s22 }
 0x73c   :  { %v581_v53 = vpop.xlane.xlu2 %580 }
 0x73d   :  { %1018 = vrcp.f32 %v581_v53  ;;  %v607_v58 = vand.u32 2147483648, %v581_v53  ;;  %v605_v60 = vand.u32 2147483647, %v581_v53  ;;  %vm601_vm10 = vweird.f32 %v581_v53 }
 0x73f   :  { %v608_v63 = vor.u32 1.1754944e-38, %v607_v58  ;;  %vm606_vm12 = vcmp.eq.f32.partialorder %v605_v60, 8.507059e+37 }
 0x743   :  { %v1019_v54 = vpop.eup %1018 }
 0x744   :  { %v597_v55 = vmul.f32 %v1019_v54, %v581_v53  ;;  %v642_v56 = vpop.permute.xlu2 %641  ;;  %v772_v57 = vpop.xlane.xlu0 %771  ;;  %vm602_vm2 = vweird.f32 %v1019_v54 }
 0x745   :  { %1020 = vrcp.f32 %v772_v57  ;;  %662 = vmatpush.msrb.mxu1 %v642_v56  ;;  %vm603_vm11 = vmor %vm601_vm10, %vm602_vm2  ;;  %v787_v4 = vand.u32 2147483648, %v772_v57  ;;  %v785_v6 = vand.u32 2147483647, %v772_v57  ;;  %vm781_vm14 = vweird.f32 %v772_v57 }
 0x746   :  { %v598_v7 = vsub.f32 1.0, %v597_v55 }
 0x747   :  { %v788_v9 = vor.u32 1.1754944e-38, %v787_v4  ;;  %vm786_vm3 = vcmp.eq.f32.partialorder %v785_v6, 8.507059e+37 }
 0x748   :  { %v599_v59 = vmul.f32 %v1019_v54, %v598_v7 }
 0x74a   :  { %v600_v61 = vadd.f32 %v1019_v54, %v599_v59 }
 0x74b   :  { %v1021_v62 = vpop.eup %1020 }
 0x74c   :  { %v604_v0 = vsel %vm603_vm11, %v1019_v54, %v600_v61  ;;  %v777_v26 = vmul.f32 %v1021_v62, %v772_v57  ;;  %vm782_vm13 = vweird.f32 %v1021_v62 }
 0x74d   :  { %v609_v1 = vsel %vm606_vm12, %v608_v63, %v604_v0  ;;  %vm783_vm15 = vmor %vm781_vm14, %vm782_vm13 }
 0x74e   :  { %v778_v2 = vsub.f32 1.0, %v777_v26  ;;  %v611_v3 = vmul.f32 %v1013_v44, %v609_v1 }
 0x750   :  { %v779_v5 = vmul.f32 %v1021_v62, %v778_v2  ;;  %614 = vst.msk [vmem:[#allocation9 + $0x28] sm:$0xff] %vm123_vm1, %v611_v3  ;;  %961 = vmatmul.msk.f32.vlgmr.msrb.gmra.mxu1 %vm123_vm1, %v611_v3 }
 0x752   :  { %v780_v8 = vadd.f32 %v1021_v62, %v779_v5 }
 0x754   :  { %v784_v10 = vsel %vm783_vm15, %v1021_v62, %v780_v8 }
 0x755   :  { %v789_v11 = vsel %vm786_vm3, %v788_v9, %v784_v10 }
 0x756   :  { %v804_v12 = vmul.f32 %v1015_v47, %v789_v11 }
 0x757   :  { %v810_v13 = vpop.permute.xlu0 %809 }
 0x758   :  { %830 = vmatpush.msra.mxu1 %v810_v13  ;;  %807 = vst.msk [vmem:[#allocation9 + $0x30] sm:$0xff] %vm123_vm1, %v804_v12 }
 0x759   :  { %968 = vmatmul.msk.f32.vlgmr.msra.gmra.mxu1 %vm123_vm1, %v804_v12 }
 0x78d   :  { %v775_v14 = vpop.xlane.xlu1 %774 }
 0x78e   :  { %1022 = vrcp.f32 %v775_v14  ;;  %v801_v19 = vand.u32 2147483648, %v775_v14  ;;  %v799_v22 = vand.u32 2147483647, %v775_v14  ;;  %vm795_vm5 = vweird.f32 %v775_v14 }
 0x790   :  { %v802_v25 = vor.u32 1.1754944e-38, %v801_v19  ;;  %vm800_vm7 = vcmp.eq.f32.partialorder %v799_v22, 8.507059e+37 }
 0x794   :  { %v1023_v15 = vpop.eup %1022 }
 0x795   :  { %v791_v17 = vmul.f32 %v1023_v15, %v775_v14  ;;  %vm796_vm4 = vweird.f32 %v1023_v15 }
 0x796   :  { %vm797_vm6 = vmor %vm795_vm5, %vm796_vm4 }
 0x797   :  { %v792_v18 = vsub.f32 1.0, %v791_v17 }
 0x799   :  { %v793_v20 = vmul.f32 %v1023_v15, %v792_v18 }
 0x79b   :  { %v794_v24 = vadd.f32 %v1023_v15, %v793_v20 }
 0x79d   :  { %v798_v27 = vsel %vm797_vm6, %v1023_v15, %v794_v24 }
 0x79e   :  { %v803_v28 = vsel %vm800_vm7, %v802_v25, %v798_v27 }
 0x79f   :  { %v805_v29 = vmul.f32 %v1341_v51, %v803_v28 }
 0x7a1   :  { %808 = vst.msk [vmem:[#allocation9 + $0x38] sm:$0xff] %vm123_vm1, %v805_v29 }
 0x7a2   :  { %925 = dma.vmem_to_hbm [thread:$0]  %s918_s24, 1024, %s920_s27, [#allocation10], %s1153_s29, %s1153_s29, %s1154_s30  }
 0x7a5   :  { %v836_v30 = vpop.permute.xlu1 %835 }
 0x7a6   :  { %856 = vmatpush.msrb.mxu0 %v836_v30 }
 0x7a7   :  { %969 = vmatmul.msk.f32.vlgmr.msrb.gmra.mxu0 %vm123_vm1, %v805_v29 }
 0x7cd   :  { %v664_v32 = vpop.f32.mrf.mxu1 }
 0x7ce   :  { %963 = vmatmul.msk.f32.gmra.mxu2 %vm123_vm1, %v664_v32 }
 0x7d6   :  { %v832_v33 = vpop.f32.mrf.mxu1 }
 0x7d7   :  { %970 = vmatmul.msk.f32.vlgmr.msrb.gmra.mxu3 %vm123_vm1, %v832_v33 }
 0x824   :  { %v858_v34 = vpop.f32.mrf.mxu0 }
 0x825   :  { %971 = vmatmul.msk.f32.gmra.mxu3 %vm123_vm1, %v858_v34 }
 0x851   :  { %v693_v44 = vpop.f32.mrf.mxu2 }
 0x852   :  { %v697_v46 = vadd.f32 %v693_v44, %v502_v45 }
 0x85a   :  { %v884_v41 = vpop.f32.mrf.mxu3 }
 0x85b   :  { %v890_v42 = vadd.f32 %v884_v41, %v696_v39 }
 0x85d   :  { %v896_v43 = vadd.f32 %v991_v40, %v890_v42 }
 0x85f   :  { %898 = vst.msk [vmem:[#allocation8] sm:$0xff] %vm85_vm0, %v896_v43 }
 0x8a8   :  { %v887_v47 = vpop.f32.mrf.mxu3 }
 0x8a9   :  { %v891_v21 = vadd.f32 %v887_v47, %v697_v46 }
 0x8ab   :  { %v897_v48 = vadd.f32 %v991_v40, %v891_v21 }
 0x8ad   :  { %899 = vst.msk [vmem:[#allocation8 + $0x8] sm:$0xff] %vm85_vm0, %v897_v48 }
 0x8ae   :  { %912 = dma.vmem_to_hbm [thread:$0]  %s905_s8, 256, %s907_s1, [#allocation4], %s1153_s29, %s1153_s29, %s1154_s30  }
 0x8af   :  { %1148 = dma.done.wait [#allocation4], 256  }
 0x8b0   :  { %1149 = vsyncadd [#allocation4], 4294967040 }
 0x8b1   :  { %1150 = dma.done.wait [#allocation10], 1024  }
 0x8b2   :  { %1151 = vsyncadd [#allocation10], 4294966272 }
 0x8b3   :  { %934 = vsyncpa [#allocation3], 1 }
 0x8b4   :  { %935 = vsyncpa [#allocation6], 1 }
 0x8b5   :  { %936 = vsyncpa [#allocation4], 1 }
 0x8b6   :  { %937 = vsyncpa [#allocation10], 1 }

</bundles_post_ra>
